<compile_context>
chip_gen: v6e
topology: v6e:2x2x1
jax: 0.10.0
libtpu: 0.0.40
codegen_flags: <defaults>
</compile_context>

<pallas_src>
import jax
import jax.numpy as jnp
from jax.experimental import pallas as pl
from jax.experimental.pallas import tpu as pltpu

MATMUL_DTYPE = jnp.bfloat16   # MXU operand dtype (accumulation stays f32)


def _round_up(n, m):
    return ((n + m - 1) // m) * m


def _pad_axis(a, axis, multiple):
    size = a.shape[axis]
    target = _round_up(size, multiple)
    if target == size:
        return a
    widths = [(0, 0)] * a.ndim
    widths[axis] = (0, target - size)
    return jnp.pad(a, widths)


# ----------------------------------------------------------------------------
# Fused kernel: branch MLP + trunk MLP + (weights @ basis.T + b0) / sqrt(p)
# ----------------------------------------------------------------------------
def _make_fused_kernel(n_branch_layers, n_trunk_layers, inv_sqrt_p):
    def _mlp(x, wb_refs, n_layers):
        # Weights stored in MATMUL_DTYPE; biases in f32 shaped (1, dout).
        for li in range(n_layers):
            w_ref = wb_refs[2 * li]
            b_ref = wb_refs[2 * li + 1]
            x = jnp.dot(x.astype(MATMUL_DTYPE), w_ref[...],
                        preferred_element_type=jnp.float32) + b_ref[...]
            if li < n_layers - 1:
                x = jnp.tanh(x)
        return x

    def kernel(*refs):
        b0_ref = refs[0]            # (1,1) SMEM, already scaled by 1/sqrt(p)
        u_ref = refs[1]             # (tm, m_pad) row tile of u_
        x_ref = refs[2]             # (tn, d_pad) row tile of x_
        pos = 3
        branch_refs = refs[pos:pos + 2 * n_branch_layers]
        pos += 2 * n_branch_layers
        trunk_refs = refs[pos:pos + 2 * n_trunk_layers]
        pos += 2 * n_trunk_layers
        o_ref = refs[pos]           # (tm, tn) output tile
        w_scratch = refs[pos + 1]   # (tm, p) f32 VMEM scratch

        # Branch output depends only on the row tile i.  j is the innermost
        # grid axis, so compute it once per i (at j == 0) and keep it resident.
        @pl.when(pl.program_id(1) == 0)
        def _():
            w_scratch[...] = _mlp(u_ref[...], branch_refs, n_branch_layers)

        # Trunk basis for this column tile.
        basis = _mlp(x_ref[...], trunk_refs, n_trunk_layers)      # (tn, p) f32

        # weights @ basis.T expressed as a last-dim contraction (no transpose).
        acc = jax.lax.dot_general(
            w_scratch[...].astype(MATMUL_DTYPE),
            basis.astype(MATMUL_DTYPE),
            dimension_numbers=(((1,), (1,)), ((), ())),
            preferred_element_type=jnp.float32)                   # (tm, tn)

        o_ref[...] = (acc * inv_sqrt_p + b0_ref[0, 0]).astype(o_ref.dtype)

    return kernel


# ----------------------------------------------------------------------------
# Wrapper
# ----------------------------------------------------------------------------
def deeponet_forward(branch_params, trunk_params, b0, u_, x_,
                     *, max_tm=256, max_tn=512):
    """(branch(u_) @ trunk(x_).T + b0) / sqrt(p) as one fused Pallas kernel."""
    p = trunk_params[-1][0].shape[1]
    assert branch_params[-1][0].shape[1] == p, "branch/trunk output dims differ"
    n_u = u_.shape[0]
    n_x = x_.shape[0]
    inv_sqrt_p = 1.0 / (float(p) ** 0.5)

    # Pad input feature dims (and first-layer weight rows) to sublane multiples.
    u_p = _pad_axis(u_, 1, 8)
    x_p = _pad_axis(x_, 1, 8)
    b_params = list(branch_params)
    t_params = list(trunk_params)
    b_params[0] = (_pad_axis(b_params[0][0], 0, 8), b_params[0][1])
    t_params[0] = (_pad_axis(t_params[0][0], 0, 8), t_params[0][1])

    # Row tiles: sublane-aligned rows, lane-dense (multiple-of-128) output cols.
    tm = min(max_tm, _round_up(n_u, 8))
    tn = min(max_tn, _round_up(n_x, 128))
    u_p = _pad_axis(u_p, 0, tm)
    x_p = _pad_axis(x_p, 0, tn)
    n_u_pad, m_pad = u_p.shape
    n_x_pad, d_pad = x_p.shape
    grid = (n_u_pad // tm, n_x_pad // tn)

    # Flatten parameters: weights in MATMUL_DTYPE, biases as (1, dout) f32.
    flat_params = []
    for (w, b) in b_params + t_params:
        flat_params.append(w.astype(MATMUL_DTYPE))
        flat_params.append(b.reshape(1, -1).astype(jnp.float32))

    # Fold b0 and the 1/sqrt(p) scale: (W B^T + b0)/sqrt(p) = W B^T * s + b0*s.
    b0_scaled = (jnp.asarray(b0, jnp.float32) * inv_sqrt_p).reshape(1, 1)

    kernel = _make_fused_kernel(len(b_params), len(t_params), inv_sqrt_p)

    in_specs = [
        pl.BlockSpec((1, 1), lambda i, j: (0, 0),
                     memory_space=pltpu.MemorySpace.SMEM),       # scaled b0
        pl.BlockSpec((tm, m_pad), lambda i, j: (i, 0)),          # u_ row tile
        pl.BlockSpec((tn, d_pad), lambda i, j: (j, 0)),          # x_ row tile
    ]
    for a in flat_params:                                        # params fully resident
        in_specs.append(pl.BlockSpec(a.shape, lambda i, j: (0, 0)))

    out = pl.pallas_call(
        kernel,
        out_shape=jax.ShapeDtypeStruct((n_u_pad, n_x_pad), jnp.float32),
        grid=grid,
        in_specs=in_specs,
        out_specs=pl.BlockSpec((tm, tn), lambda i, j: (i, j)),
        scratch_shapes=[pltpu.VMEM((tm, p), jnp.float32)],
        compiler_params=pltpu.CompilerParams(
            dimension_semantics=("parallel", "arbitrary")),
    )(b0_scaled, u_p, x_p, *flat_params)

    return out[:n_u, :n_x]


# ----------------------------------------------------------------------------
# Deterministic parameters + pure-JAX reference (mirrors the bf16 matmul path)
# ----------------------------------------------------------------------------
def make_mlp_params(key, dims):
    params = []
    for din, dout in zip(dims[:-1], dims[1:]):
        key, kw, kb = jax.random.split(key, 3)
        scale = 1.0 / (din ** 0.5)
        w = jax.random.uniform(kw, (din, dout), jnp.float32, -scale, scale)
        b = jax.random.uniform(kb, (dout,), jnp.float32, -scale, scale)
        params.append((w, b))
    return params


def reference_forward(branch_params, trunk_params, b0, u_, x_):
    p = trunk_params[-1][0].shape[1]

    def mlp(params, x):
        for i, (w, b) in enumerate(params):
            x = jnp.dot(x.astype(MATMUL_DTYPE), w.astype(MATMUL_DTYPE),
                        preferred_element_type=jnp.float32) + b
            if i < len(params) - 1:
                x = jnp.tanh(x)
        return x

    weights = mlp(branch_params, u_)
    basis = mlp(trunk_params, x_)
    wb = jax.lax.dot_general(weights.astype(MATMUL_DTYPE),
                             basis.astype(MATMUL_DTYPE),
                             dimension_numbers=(((1,), (1,)), ((), ())),
                             preferred_element_type=jnp.float32)
    return (wb + b0) / (float(p) ** 0.5)


if __name__ == "__main__":
    # Small, module-consistent shapes.
    N_U = 16       # number of input functions (branch batch)
    M_SENS = 16    # branch input dimension (sensor values)
    N_X = 64       # number of trunk evaluation points
    D_TRUNK = 2    # trunk input dimension (coordinates)
    HIDDEN = 128
    P = 128        # trunk.output_dimension == branch output dimension

    key = jax.random.PRNGKey(0)
    k_branch, k_trunk, k_u, k_x = jax.random.split(key, 4)

    branch_params = make_mlp_params(k_branch, [M_SENS, HIDDEN, P])
    trunk_params = make_mlp_params(k_trunk, [D_TRUNK, HIDDEN, P])
    b0 = jnp.array(0.25, jnp.float32)   # torch.nn.Parameter(torch.tensor(0.0)), nonzero here

    u_ = jax.random.normal(k_u, (N_U, M_SENS), jnp.float32)
    x_ = jax.random.normal(k_x, (N_X, D_TRUNK), jnp.float32)

    fwd = jax.jit(lambda u, x: deeponet_forward(branch_params, trunk_params, b0, u, x))
    out = jax.block_until_ready(fwd(u_, x_))

    ref = reference_forward(branch_params, trunk_params, b0, u_, x_)
    assert out.shape == (N_U, N_X)
    # Reference mirrors the kernel's bf16-operand / f32-accumulate matmuls;
    # tolerance covers possible tanh-approximation ulp differences.
    assert jnp.allclose(out, ref, atol=5e-3, rtol=5e-3), "mismatch vs reference"

    print("KERNEL_OK")
</pallas_src>

<mosaic_0001>
module attributes {stable_mosaic.version = 11 : i64} {
  func.func @kernel(%arg0: i32, %arg1: i32, %arg2: memref<1x1xf32, #tpu.memory_space<smem>>, %arg3: memref<16x16xf32, #tpu.memory_space<vmem>>, %arg4: memref<128x8xf32, #tpu.memory_space<vmem>>, %arg5: memref<16x128xbf16, #tpu.memory_space<vmem>>, %arg6: memref<1x128xf32, #tpu.memory_space<vmem>>, %arg7: memref<128x128xbf16, #tpu.memory_space<vmem>>, %arg8: memref<1x128xf32, #tpu.memory_space<vmem>>, %arg9: memref<8x128xbf16, #tpu.memory_space<vmem>>, %arg10: memref<1x128xf32, #tpu.memory_space<vmem>>, %arg11: memref<128x128xbf16, #tpu.memory_space<vmem>>, %arg12: memref<1x128xf32, #tpu.memory_space<vmem>>, %arg13: memref<16x128xf32, #tpu.memory_space<vmem>>, %arg14: memref<16x128xf32, #tpu.memory_space<vmem>>) attributes {dimension_semantics = [#tpu.dimension_semantics<parallel>, #tpu.dimension_semantics<arbitrary>], iteration_bounds = array<i64: 1, 1>, scalar_prefetch = 0 : i64, scratch_operands = 1 : i64, tpu.core_type = #tpu.core_type<tc>, window_params = [{transform_indices = @transform_0, window_bounds = array<i64: 1, 1>}, {transform_indices = @transform_1, window_bounds = array<i64: 16, 16>}, {transform_indices = @transform_2, window_bounds = array<i64: 128, 8>}, {pipeline_mode = #tpu.pipeline_mode<synchronous>, transform_indices = @transform_3, window_bounds = array<i64: 16, 128>}, {pipeline_mode = #tpu.pipeline_mode<synchronous>, transform_indices = @transform_4, window_bounds = array<i64: 1, 128>}, {pipeline_mode = #tpu.pipeline_mode<synchronous>, transform_indices = @transform_5, window_bounds = array<i64: 128, 128>}, {pipeline_mode = #tpu.pipeline_mode<synchronous>, transform_indices = @transform_6, window_bounds = array<i64: 1, 128>}, {pipeline_mode = #tpu.pipeline_mode<synchronous>, transform_indices = @transform_7, window_bounds = array<i64: 8, 128>}, {pipeline_mode = #tpu.pipeline_mode<synchronous>, transform_indices = @transform_8, window_bounds = array<i64: 1, 128>}, {pipeline_mode = #tpu.pipeline_mode<synchronous>, transform_indices = @transform_9, window_bounds = array<i64: 128, 128>}, {pipeline_mode = #tpu.pipeline_mode<synchronous>, transform_indices = @transform_10, window_bounds = array<i64: 1, 128>}, {transform_indices = @transform_11, window_bounds = array<i64: 16, 128>}]} {
    %c0_i32 = arith.constant 0 : i32
    %0 = arith.cmpi eq, %arg1, %c0_i32 : i32
    %1 = arith.extui %0 : i1 to i32
    %c0_i32_0 = arith.constant 0 : i32
    %2 = arith.cmpi ne, %1, %c0_i32_0 : i32
    scf.if %2 {
      %c0_19 = arith.constant 0 : index
      %c0_20 = arith.constant 0 : index
      %27 = vector.load %arg3[%c0_19, %c0_20] : memref<16x16xf32, #tpu.memory_space<vmem>>, vector<16x16xf32>
      %28 = arith.truncf %27 : vector<16x16xf32> to vector<16x16xbf16>
      %c0_21 = arith.constant 0 : index
      %c0_22 = arith.constant 0 : index
      %29 = vector.load %arg5[%c0_21, %c0_22] : memref<16x128xbf16, #tpu.memory_space<vmem>>, vector<16x128xbf16>
      %cst_23 = arith.constant dense<0.000000e+00> : vector<16x128xf32>
      %30 = tpu.matmul %28, %29, %cst_23 {dimension_numbers = #tpu.dot_dimension_numbers<[1], [0], [0], [1], [0, 0, 1, 1], [], []>} : vector<16x16xbf16>, vector<16x128xbf16>, vector<16x128xf32> -> vector<16x128xf32>
      %c0_24 = arith.constant 0 : index
      %c0_25 = arith.constant 0 : index
      %31 = vector.load %arg6[%c0_24, %c0_25] : memref<1x128xf32, #tpu.memory_space<vmem>>, vector<1x128xf32>
      %32 = vector.broadcast %31 : vector<1x128xf32> to vector<16x128xf32>
      %33 = arith.addf %30, %32 : vector<16x128xf32>
      %34 = math.tanh %33 : vector<16x128xf32>
      %35 = arith.truncf %34 : vector<16x128xf32> to vector<16x128xbf16>
      %c0_26 = arith.constant 0 : index
      %c0_27 = arith.constant 0 : index
      %36 = vector.load %arg7[%c0_26, %c0_27] : memref<128x128xbf16, #tpu.memory_space<vmem>>, vector<128x128xbf16>
      %cst_28 = arith.constant dense<0.000000e+00> : vector<16x128xf32>
      %37 = tpu.matmul %35, %36, %cst_28 {dimension_numbers = #tpu.dot_dimension_numbers<[1], [0], [0], [1], [0, 0, 1, 1], [], []>} : vector<16x128xbf16>, vector<128x128xbf16>, vector<16x128xf32> -> vector<16x128xf32>
      %c0_29 = arith.constant 0 : index
      %c0_30 = arith.constant 0 : index
      %38 = vector.load %arg8[%c0_29, %c0_30] : memref<1x128xf32, #tpu.memory_space<vmem>>, vector<1x128xf32>
      %39 = vector.broadcast %38 : vector<1x128xf32> to vector<16x128xf32>
      %40 = arith.addf %37, %39 : vector<16x128xf32>
      %c0_31 = arith.constant 0 : index
      %c0_32 = arith.constant 0 : index
      %41 = vector.load %arg14[%c0_31, %c0_32] : memref<16x128xf32, #tpu.memory_space<vmem>>, vector<16x128xf32>
      tpu.vector_store %arg14[%c0_31, %c0_32], %40 {strides = array<i32>} : memref<16x128xf32, #tpu.memory_space<vmem>>, vector<16x128xf32>,
    } else {
    }
    %c0 = arith.constant 0 : index
    %c0_1 = arith.constant 0 : index
    %3 = vector.load %arg4[%c0, %c0_1] : memref<128x8xf32, #tpu.memory_space<vmem>>, vector<128x8xf32>
    %4 = arith.truncf %3 : vector<128x8xf32> to vector<128x8xbf16>
    %c0_2 = arith.constant 0 : index
    %c0_3 = arith.constant 0 : index
    %5 = vector.load %arg9[%c0_2, %c0_3] : memref<8x128xbf16, #tpu.memory_space<vmem>>, vector<8x128xbf16>
    %cst = arith.constant dense<0.000000e+00> : vector<128x128xf32>
    %6 = tpu.matmul %4, %5, %cst {dimension_numbers = #tpu.dot_dimension_numbers<[1], [0], [0], [1], [0, 0, 1, 1], [], []>} : vector<128x8xbf16>, vector<8x128xbf16>, vector<128x128xf32> -> vector<128x128xf32>
    %c0_4 = arith.constant 0 : index
    %c0_5 = arith.constant 0 : index
    %7 = vector.load %arg10[%c0_4, %c0_5] : memref<1x128xf32, #tpu.memory_space<vmem>>, vector<1x128xf32>
    %8 = vector.broadcast %7 : vector<1x128xf32> to vector<128x128xf32>
    %9 = arith.addf %6, %8 : vector<128x128xf32>
    %10 = math.tanh %9 : vector<128x128xf32>
    %11 = arith.truncf %10 : vector<128x128xf32> to vector<128x128xbf16>
    %c0_6 = arith.constant 0 : index
    %c0_7 = arith.constant 0 : index
    %12 = vector.load %arg11[%c0_6, %c0_7] : memref<128x128xbf16, #tpu.memory_space<vmem>>, vector<128x128xbf16>
    %cst_8 = arith.constant dense<0.000000e+00> : vector<128x128xf32>
    %13 = tpu.matmul %11, %12, %cst_8 {dimension_numbers = #tpu.dot_dimension_numbers<[1], [0], [0], [1], [0, 0, 1, 1], [], []>} : vector<128x128xbf16>, vector<128x128xbf16>, vector<128x128xf32> -> vector<128x128xf32>
    %c0_9 = arith.constant 0 : index
    %c0_10 = arith.constant 0 : index
    %14 = vector.load %arg12[%c0_9, %c0_10] : memref<1x128xf32, #tpu.memory_space<vmem>>, vector<1x128xf32>
    %15 = vector.broadcast %14 : vector<1x128xf32> to vector<128x128xf32>
    %16 = arith.addf %13, %15 : vector<128x128xf32>
    %c0_11 = arith.constant 0 : index
    %c0_12 = arith.constant 0 : index
    %17 = vector.load %arg14[%c0_11, %c0_12] : memref<16x128xf32, #tpu.memory_space<vmem>>, vector<16x128xf32>
    %18 = arith.truncf %17 : vector<16x128xf32> to vector<16x128xbf16>
    %19 = arith.truncf %16 : vector<128x128xf32> to vector<128x128xbf16>
    %cst_13 = arith.constant dense<0.000000e+00> : vector<16x128xf32>
    %20 = tpu.matmul %18, %19, %cst_13 {dimension_numbers = #tpu.dot_dimension_numbers<[1], [1], [0], [0], [0, 0, 1, 0], [], []>} : vector<16x128xbf16>, vector<128x128xbf16>, vector<16x128xf32> -> vector<16x128xf32>
    %cst_14 = arith.constant 0.0883883461 : f32
    %21 = vector.broadcast %cst_14 : f32 to vector<16x128xf32>
    %22 = arith.mulf %20, %21 : vector<16x128xf32>
    %c0_15 = arith.constant 0 : index
    %c0_16 = arith.constant 0 : index
    %23 = memref.load %arg2[%c0_15, %c0_16] : memref<1x1xf32, #tpu.memory_space<smem>>
    %24 = vector.broadcast %23 : f32 to vector<16x128xf32>
    %25 = arith.addf %22, %24 : vector<16x128xf32>
    %c0_17 = arith.constant 0 : index
    %c0_18 = arith.constant 0 : index
    %26 = vector.load %arg13[%c0_17, %c0_18] : memref<16x128xf32, #tpu.memory_space<vmem>>, vector<16x128xf32>
    tpu.vector_store %arg13[%c0_17, %c0_18], %25 {strides = array<i32>} : memref<16x128xf32, #tpu.memory_space<vmem>>, vector<16x128xf32>,
    return
  }
  func.func @transform_0(%arg0: i32, %arg1: i32) -> (i32, i32) {
    %c0_i32 = arith.constant 0 : i32
    %c0_i32_0 = arith.constant 0 : i32
    %c0_i32_1 = arith.constant 0 : i32
    return %c0_i32, %c0_i32_0 : i32, i32
  }
  func.func @transform_1(%arg0: i32, %arg1: i32) -> (i32, i32) {
    %c0_i32 = arith.constant 0 : i32
    %c0_i32_0 = arith.constant 0 : i32
    return %arg0, %c0_i32 : i32, i32
  }
  func.func @transform_2(%arg0: i32, %arg1: i32) -> (i32, i32) {
    %c0_i32 = arith.constant 0 : i32
    %c0_i32_0 = arith.constant 0 : i32
    return %arg1, %c0_i32 : i32, i32
  }
  func.func @transform_3(%arg0: i32, %arg1: i32) -> (i32, i32) {
    %c0_i32 = arith.constant 0 : i32
    %c0_i32_0 = arith.constant 0 : i32
    %c0_i32_1 = arith.constant 0 : i32
    return %c0_i32, %c0_i32_0 : i32, i32
  }
  func.func @transform_4(%arg0: i32, %arg1: i32) -> (i32, i32) {
    %c0_i32 = arith.constant 0 : i32
    %c0_i32_0 = arith.constant 0 : i32
    %c0_i32_1 = arith.constant 0 : i32
    return %c0_i32, %c0_i32_0 : i32, i32
  }
  func.func @transform_5(%arg0: i32, %arg1: i32) -> (i32, i32) {
    %c0_i32 = arith.constant 0 : i32
    %c0_i32_0 = arith.constant 0 : i32
    %c0_i32_1 = arith.constant 0 : i32
    return %c0_i32, %c0_i32_0 : i32, i32
  }
  func.func @transform_6(%arg0: i32, %arg1: i32) -> (i32, i32) {
    %c0_i32 = arith.constant 0 : i32
    %c0_i32_0 = arith.constant 0 : i32
    %c0_i32_1 = arith.constant 0 : i32
    return %c0_i32, %c0_i32_0 : i32, i32
  }
  func.func @transform_7(%arg0: i32, %arg1: i32) -> (i32, i32) {
    %c0_i32 = arith.constant 0 : i32
    %c0_i32_0 = arith.constant 0 : i32
    %c0_i32_1 = arith.constant 0 : i32
    return %c0_i32, %c0_i32_0 : i32, i32
  }
  func.func @transform_8(%arg0: i32, %arg1: i32) -> (i32, i32) {
    %c0_i32 = arith.constant 0 : i32
    %c0_i32_0 = arith.constant 0 : i32
    %c0_i32_1 = arith.constant 0 : i32
    return %c0_i32, %c0_i32_0 : i32, i32
  }
  func.func @transform_9(%arg0: i32, %arg1: i32) -> (i32, i32) {
    %c0_i32 = arith.constant 0 : i32
    %c0_i32_0 = arith.constant 0 : i32
    %c0_i32_1 = arith.constant 0 : i32
    return %c0_i32, %c0_i32_0 : i32, i32
  }
  func.func @transform_10(%arg0: i32, %arg1: i32) -> (i32, i32) {
    %c0_i32 = arith.constant 0 : i32
    %c0_i32_0 = arith.constant 0 : i32
    %c0_i32_1 = arith.constant 0 : i32
    return %c0_i32, %c0_i32_0 : i32, i32
  }
  func.func @transform_11(%arg0: i32, %arg1: i32) -> (i32, i32) {
    %c0_i32 = arith.constant 0 : i32
    return %arg0, %arg1 : i32, i32
  }
}

</mosaic_0001>

<bundles_post_ra>
// kernel: _lambda_.1
= control target key start
LH: loop header
LB: loop body
LE: loop exit
PB: predicated region body
PF: predicated region fallthrough
CT: control target
= control target key end

     0   :  { %v903_v1 = vmov 0.0   ;;  %vm904_vm0 = vmmov 0   ;;  %vm63_vm1 = vcmask 130048   ;;  %vm282_vm2 = vcmask 1043456   ;;  %s1125_s0 = inlined_call_operand.<no memory space> [shape: f32[1,1], index: 0, kind: input, shape index: {}]   ;;  %s1126_s1 = inlined_call_operand.vmem [shape: f32[16,16], index: 1, kind: input, shape index: {}]   ;;  %s1127_s2 = inlined_call_operand.vmem [shape: f32[128,8], index: 2, kind: input, shape index: {}]   ;;  %s1128_s3 = inlined_call_operand.vmem [shape: bf16[16,128], index: 3, kind: input, shape index: {}]   ;;  %s1129_s4 = inlined_call_operand.vmem [shape: f32[1,128], index: 4, kind: input, shape index: {}]   ;;  %s1130_s5 = inlined_call_operand.vmem [shape: bf16[128,128], index: 5, kind: input, shape index: {}]   ;;  %s1131_s6 = inlined_call_operand.vmem [shape: f32[1,128], index: 6, kind: input, shape index: {}]   ;;  %s1132_s7 = inlined_call_operand.vmem [shape: bf16[8,128], index: 7, kind: input, shape index: {}]   ;;  %s1133_s8 = inlined_call_operand.vmem [shape: f32[1,128], index: 8, kind: input, shape index: {}]   ;;  %s1134_s9 = inlined_call_operand.vmem [shape: bf16[128,128], index: 9, kind: input, shape index: {}]   ;;  %s1135_s10 = inlined_call_operand.vmem [shape: f32[1,128], index: 10, kind: input, shape index: {}]   ;;  %s1136_s11 = inlined_call_operand.hbm [shape: f32[16,128], index: 11, kind: output, shape index: {}]  }
   0x1   :  { %v828_v0 = vld [vmem:[%s1128_s3] sm:$0xff]   ;;  %726 = vmatprep.subr.bf16.mxu0 %v903_v1  ;;  %v46_v3 = vld [vmem:[%s1126_s1 + $0x8] sm:$0xff]  ;;  %732 = vmatprep.subr.bf16.mxu1 %v903_v1  ;;  %vm257_vm3 = vcmask 64512   ;;  %v227_v10 = vld [vmem:[%s1127_s2 + $0x10] sm:$0xff] }
   0x2   :  { %v45_v2 = vld [vmem:[%s1126_s1] sm:$0xff]  ;;  %727 = vmatpush3.bf16.msra.mxu0 %v828_v0  ;;  %728 = vmatprep.mubr.msk.bf16.mxu0 %vm904_vm0, %v903_v1  ;;  %v226_v7 = vld [vmem:[%s1127_s2 + $0x8] sm:$0xff]  ;;  %v228_v11 = vld [vmem:[%s1127_s2 + $0x18] sm:$0xff] }
   0x3   :  { %v249_v4 = vld [vmem:[%s1132_s7] sm:$0xf]  ;;  %v47_v5 = vpack.c.bf16 %v46_v3, %v45_v2  ;;  %748 = vmatprep.mubr.msk.bf16.mxu1 %vm904_vm0, %v903_v1  ;;  %v230_v13 = vld [vmem:[%s1127_s2 + $0x28] sm:$0xff]  ;;  %v829_v14 = vld [vmem:[%s1130_s5 + $0x38] sm:$0xff]   ;;  %v242_v15 = vpack.c.bf16 %v228_v11, %v227_v10 }
   0x4   :  { %v225_v6 = vld [vmem:[%s1127_s2] sm:$0xff]  ;;  %822 = vmatprep.subr.msk.bf16.mxu0 %vm282_vm2, %v249_v4  ;;  %v284_v8 = vsel %vm282_vm2, %v249_v4, 0  ;;  %v830_v16 = vld [vmem:[%s1130_s5 + $0x30] sm:$0xff]   ;;  %733 = vmatpush3.bf16.msra.mxu1 %v829_v14  ;;  %v232_v19 = vld [vmem:[%s1127_s2 + $0x38] sm:$0xff] }
   0x5   :  { %v241_v9 = vpack.c.bf16 %v226_v7, %v225_v6  ;;  %729 = vmatmul.mubr.msk.bf16.vlgmr.msra.gmra.mxu0 %vm63_vm1, %v47_v5  ;;  %v229_v12 = vld [vmem:[%s1127_s2 + $0x20] sm:$0xff]  ;;  %734 = vmatprep.subr.bf16.mxu1 %v903_v1  ;;  %v231_v18 = vld [vmem:[%s1127_s2 + $0x30] sm:$0xff]  ;;  %v234_v21 = vld [vmem:[%s1127_s2 + $0x48] sm:$0xff] }
   0x6   :  { %753 = vmatpush3.bf16.msra.mxu0 %v284_v8  ;;  %v243_v17 = vpack.c.bf16 %v230_v13, %v229_v12  ;;  %v233_v20 = vld [vmem:[%s1127_s2 + $0x40] sm:$0xff]  ;;  %v244_v22 = vpack.c.bf16 %v232_v19, %v231_v18 }
   0x7   :  { %754 = vmatprep.mubr.msk.bf16.mxu0 %vm257_vm3, %v241_v9  ;;  %v245_v23 = vpack.c.bf16 %v234_v21, %v233_v20 }
   0x8   :  { %735 = vmatpush3.bf16.msra.mxu1 %v830_v16 }
   0x9   :  { %736 = vmatprep.subr.bf16.mxu1 %v903_v1 }
   0xd   :  { %755 = vmatmul.mubr.msk.bf16.vlgmr.msra.gmra.mxu0 %vm257_vm3, %v242_v15 }
   0xe   :  { %758 = vmatprep.mubr.msk.bf16.mxu0 %vm257_vm3, %v243_v17 }
   0xf   :  { %17 = vsyncpa [#allocation5], 0  ;;  %v235_v24 = vld [vmem:[%s1127_s2 + $0x50] sm:$0xff]  ;;  %v236_v25 = vld [vmem:[%s1127_s2 + $0x58] sm:$0xff]  ;;  %s905_s3 = smov [#allocation4]  }
  0x10   :  { %v237_v26 = vld [vmem:[%s1127_s2 + $0x60] sm:$0xff]  ;;  %v238_v27 = vld [vmem:[%s1127_s2 + $0x68] sm:$0xff]  ;;  %v246_v28 = vpack.c.bf16 %v236_v25, %v235_v24  ;;  %v239_v30 = vld [vmem:[%s1127_s2 + $0x70] sm:$0xff]  ;;  %s640_s25 = sshll.u32 %s905_s3, 4  ;;  %s641_s25 = int_to_ptr.vmem [resolvable:$true] %s640_s25 }
  0x11   :  { %v247_v29 = vpack.c.bf16 %v238_v27, %v237_v26  ;;  %v240_v31 = vld [vmem:[%s1127_s2 + $0x78] sm:$0xff]  ;;  %v831_v33 = vld [vmem:[%s1130_s5 + $0x28] sm:$0xff]   ;;  %v833_v35 = vld [vmem:[%s1130_s5 + $0x20] sm:$0xff]   ;;  %s881_s26 = scalar_lea.vmem %s641_s25, 256  ;;  %p886_p1 = scmp.lt.s32.totalorder %s641_s25, %s641_s25 }
  0x12   :  { %v248_v32 = vpack.c.bf16 %v240_v31, %v239_v30  ;;  %737 = vmatpush3.bf16.msra.mxu1 %v831_v33  ;;  %v832_v34 = vld [vmem:[%s1134_s9 + $0x38] sm:$0xff]   ;;  %v834_v36 = vld [vmem:[%s1134_s9 + $0x30] sm:$0xff]   ;;  %v836_v38 = vld [vmem:[%s1134_s9 + $0x28] sm:$0xff]   ;;  %p882_p0 = scmp.ne.s32.totalorder %s641_s25, %s881_s26  ;;  %p887_p2 = scmp.lt.s32.totalorder %s881_s26, %s881_s26 }
  0x13   :  { %738 = vmatprep.subr.bf16.mxu1 %v903_v1  ;;  %770 = vmatprep.subr.bf16.mxu0 %v832_v34  ;;  %v835_v37 = vld [vmem:[%s1130_s5 + $0x18] sm:$0xff]   ;;  %v837_v39 = vld [vmem:[%s1130_s5 + $0x10] sm:$0xff]   ;;  %v838_v40 = vld [vmem:[%s1134_s9 + $0x20] sm:$0xff]  }
  0x14   :  { %771 = vmatpush3.bf16.msra.mxu0 %v832_v34  ;;  %v839_v41 = vld [vmem:[%s1130_s5 + $0x8] sm:$0xff]   ;;  %v840_v42 = vld [vmem:[%s1134_s9 + $0x18] sm:$0xff]   ;;  %v841_v43 = vld [vmem:[%s1130_s5] sm:$0xff]   ;;  %p888_p3 = por %p887_p2, %p886_p1 }
  0x15   :  { %759 = vmatmul.mubr.msk.bf16.gmra.mxu0 %vm257_vm3, %v244_v22  ;;  %772 = vmatprep.subr.bf16.mxu0 %v834_v36  ;;  %v842_v44 = vld [vmem:[%s1134_s9 + $0x10] sm:$0xff]   ;;  %v843_v45 = vld [vmem:[%s1134_s9 + $0x8] sm:$0xff]   ;;  %v844_v46 = vld [vmem:[%s1134_s9] sm:$0xff]  }
  0x16   :  { %762 = vmatprep.mubr.msk.bf16.mxu0 %vm257_vm3, %v245_v23  ;;  %739 = vmatpush3.bf16.msra.mxu1 %v833_v35  ;;  %v651_v47 = vld [vmem:[%s1129_s4] ss:$0 sm:$0xff]  ;;  %p889_p4 = pnand %p888_p3, %p882_p0 }
  0x17   :  { %740 = vmatprep.subr.bf16.mxu1 %v903_v1  ;;  %v663_v55 = vld [vmem:[%s1133_s8] ss:$0 sm:$0xff] }
  0x18   :  { %773 = vmatpush3.bf16.msra.mxu0 %v834_v36 }
  0x19   :  { %774 = vmatprep.subr.bf16.mxu0 %v836_v38 }
  0x1a   :  { %741 = vmatpush3.bf16.msra.mxu1 %v835_v37 }
  0x1b   :  { %742 = vmatprep.subr.bf16.mxu1 %v903_v1 }
  0x1c   :  { %775 = vmatpush3.bf16.msra.mxu0 %v836_v38 }
  0x1d   :  { %763 = vmatmul.mubr.msk.bf16.gmra.mxu0 %vm257_vm3, %v246_v28  ;;  %776 = vmatprep.subr.bf16.mxu0 %v838_v40 }
  0x1e   :  { %766 = vmatprep.mubr.msk.bf16.mxu0 %vm257_vm3, %v247_v29  ;;  %743 = vmatpush3.bf16.msra.mxu1 %v837_v39 }
  0x1f   :  { %744 = vmatprep.subr.bf16.mxu1 %v903_v1 }
  0x20   :  { %777 = vmatpush3.bf16.msra.mxu0 %v838_v40 }
  0x21   :  { %778 = vmatprep.subr.bf16.mxu0 %v840_v42 }
  0x22   :  { %745 = vmatpush3.bf16.msra.mxu1 %v839_v41 }
  0x23   :  { %746 = vmatprep.subr.bf16.mxu1 %v903_v1 }
  0x24   :  { %779 = vmatpush3.bf16.msra.mxu0 %v840_v42 }
  0x25   :  { %767 = vmatmul.mubr.msk.bf16.gmra.mxu0 %vm257_vm3, %v248_v32  ;;  %780 = vmatprep.subr.bf16.mxu0 %v842_v44 }
  0x26   :  { %747 = vmatpush3.bf16.msra.mxu1 %v841_v43 }
  0x27   :  { %802 = vmatprep.subr.bf16.mxu1 %v903_v1 }
  0x28   :  { %781 = vmatpush3.bf16.msra.mxu0 %v842_v44 }
  0x29   :  { %782 = vmatprep.subr.bf16.mxu0 %v843_v45 }
  0x2c   :  { %783 = vmatpush3.bf16.msra.mxu0 %v843_v45 }
  0x2d   :  { %784 = vmatprep.subr.bf16.mxu0 %v844_v46 }
  0x30   :  { %785 = vmatpush3.bf16.msra.mxu0 %v844_v46 }
  0xc5   :  { %v101_v48 = vpop.f32.mrf.mxu0 }
  0xc6   :  { %v102_v49 = vadd.f32 %v651_v47, %v101_v48 }
  0xc7   :  { %v730_v50 = vpop.f32.mrf.mxu0 }
  0xc8   :  { %845 = vtanh.f32 %v102_v49 }
  0xc9   :  { %v104_v51 = vpop.f32.mrf.mxu0 }
  0xca   :  { %v105_v52 = vadd.f32 %v651_v47, %v104_v51 }
  0xcb   :  { %v731_v53 = vpop.f32.mrf.mxu0 }
  0xcc   :  { %847 = vtanh.f32 %v105_v52  ;;  %v654_v52 = vld [vmem:[%s1131_s6] ss:$0 sm:$0xff] }
  0xcd   :  { %v756_v54 = vpop.f32.mrf.mxu0 }
  0xce   :  { %v329_v60 = vadd.f32 %v756_v54, %v663_v55 }
  0xcf   :  { %v320_v56 = vpop.f32.mrf.mxu0 }
  0xd0   :  { %v321_v57 = vadd.f32 %v663_v55, %v320_v56 }
  0xd1   :  { %v757_v58 = vpop.f32.mrf.mxu0 }
  0xd2   :  { %v332_v59 = vadd.f32 %v757_v58, %v663_v55  ;;  %849 = vtanh.f32 %v321_v57 }
  0xd3   :  { %v323_v61 = vpop.f32.mrf.mxu0 }
  0xd4   :  { %v324_v62 = vadd.f32 %v663_v55, %v323_v61  ;;  %851 = vtanh.f32 %v332_v59 }
  0xd5   :  { %v760_v63 = vpop.f32.mrf.mxu0  ;;  %v846_v2 = vpop.eup %845 }
  0xd6   :  { %853 = vtanh.f32 %v324_v62  ;;  %v345_v8 = vadd.f32 %v760_v63, %v663_v55 }
  0xd7   :  { %855 = vtanh.f32 %v329_v60  ;;  %v336_v0 = vpop.f32.mrf.mxu0  ;;  %v672_v60 = vld [vmem:[%s1135_s10] ss:$0 sm:$0xff] }
  0xd8   :  { %v337_v3 = vadd.f32 %v663_v55, %v336_v0 }
  0xd9   :  { %v848_v4 = vpop.eup %847  ;;  %v761_v5 = vpop.f32.mrf.mxu0 }
  0xda   :  { %v348_v6 = vadd.f32 %v761_v5, %v663_v55  ;;  %v110_v7 = vpack.c.bf16 %v848_v4, %v846_v2  ;;  %857 = vtanh.f32 %v337_v3 }
  0xdb   :  { %v339_v9 = vpop.f32.mrf.mxu0 }
  0xdc   :  { %v340_v10 = vadd.f32 %v663_v55, %v339_v9  ;;  %749 = vmatmul.mubr.bf16.vlgmr.msra.gmra.mxu1 %v110_v7  ;;  %859 = vtanh.f32 %v348_v6 }
  0xdd   :  { %v764_v11 = vpop.f32.mrf.mxu0  ;;  %818 = vmatprep.mubr.msk.bf16.mxu1 %vm904_vm0, %v903_v1 }
  0xde   :  { %861 = vtanh.f32 %v340_v10  ;;  %v361_v19 = vadd.f32 %v764_v11, %v663_v55 }
  0xdf   :  { %863 = vtanh.f32 %v345_v8  ;;  %v352_v12 = vpop.f32.mrf.mxu0  ;;  %v850_v14 = vpop.eup %849 }
  0xe0   :  { %v353_v13 = vadd.f32 %v663_v55, %v352_v12 }
  0xe1   :  { %v765_v15 = vpop.f32.mrf.mxu0  ;;  %v852_v16 = vpop.eup %851 }
  0xe2   :  { %v364_v17 = vadd.f32 %v765_v15, %v663_v55  ;;  %865 = vtanh.f32 %v353_v13 }
  0xe3   :  { %v854_v18 = vpop.eup %853  ;;  %v355_v20 = vpop.f32.mrf.mxu0 }
  0xe4   :  { %v856_v21 = vpop.eup %855  ;;  %v356_v22 = vadd.f32 %v663_v55, %v355_v20  ;;  %v399_v23 = vpack.c.bf16 %v854_v18, %v850_v14  ;;  %867 = vtanh.f32 %v364_v17 }
  0xe5   :  { %v768_v24 = vpop.f32.mrf.mxu0  ;;  %v400_v25 = vpack.c.bf16 %v852_v16, %v856_v21 }
  0xe6   :  { %869 = vtanh.f32 %v356_v22  ;;  %786 = vmatprep.mubr.bf16.mxu0 %v399_v23  ;;  %v377_v33 = vadd.f32 %v768_v24, %v663_v55 }
  0xe7   :  { %871 = vtanh.f32 %v361_v19  ;;  %v368_v26 = vpop.f32.mrf.mxu0  ;;  %787 = vmatmul.mubr.bf16.vlgmr.msra.gmra.mxu0 %v400_v25  ;;  %v858_v28 = vpop.eup %857 }
  0xe8   :  { %v369_v27 = vadd.f32 %v663_v55, %v368_v26 }
  0xe9   :  { %v769_v29 = vpop.f32.mrf.mxu0  ;;  %v860_v30 = vpop.eup %859 }
  0xea   :  { %v380_v31 = vadd.f32 %v769_v29, %v663_v55  ;;  %873 = vtanh.f32 %v369_v27 }
  0xeb   :  { %v862_v32 = vpop.eup %861  ;;  %v371_v34 = vpop.f32.mrf.mxu0 }
  0xec   :  { %v864_v35 = vpop.eup %863  ;;  %v372_v36 = vadd.f32 %v663_v55, %v371_v34  ;;  %v401_v37 = vpack.c.bf16 %v862_v32, %v858_v28  ;;  %875 = vtanh.f32 %v380_v31 }
  0xed   :  { %v402_v38 = vpack.c.bf16 %v860_v30, %v864_v35 }
  0xee   :  { %877 = vtanh.f32 %v372_v36  ;;  %790 = vmatprep.mubr.bf16.mxu0 %v401_v37 }
  0xef   :  { %879 = vtanh.f32 %v377_v33  ;;  %791 = vmatmul.mubr.bf16.gmra.mxu0 %v402_v38  ;;  %v866_v39 = vpop.eup %865  ;;  %v630_v38 = vstv %s1125_s0 }
  0xf1   :  { %v868_v40 = vpop.eup %867 }
  0xf3   :  { %v870_v41 = vpop.eup %869 }
  0xf4   :  { %v872_v42 = vpop.eup %871  ;;  %v403_v43 = vpack.c.bf16 %v870_v41, %v866_v39 }
  0xf5   :  { %v404_v44 = vpack.c.bf16 %v868_v40, %v872_v42 }
  0xf6   :  { %794 = vmatprep.mubr.bf16.mxu0 %v403_v43 }
  0xf7   :  { %795 = vmatmul.mubr.bf16.gmra.mxu0 %v404_v44  ;;  %v874_v45 = vpop.eup %873 }
  0xf9   :  { %v876_v46 = vpop.eup %875 }
  0xfb   :  { %v878_v47 = vpop.eup %877 }
  0xfc   :  { %v880_v48 = vpop.eup %879  ;;  %v405_v49 = vpack.c.bf16 %v878_v47, %v874_v45 }
  0xfd   :  { %v406_v50 = vpack.c.bf16 %v876_v46, %v880_v48 }
  0xfe   :  { %798 = vmatprep.mubr.bf16.mxu0 %v405_v49 }
  0xff   :  { %799 = vmatmul.mubr.bf16.gmra.mxu0 %v406_v50 }
 0x19c   :  { %v216_v51 = vpop.f32.mrf.mxu1 }
 0x19d   :  { %v217_v55 = vadd.f32 %v654_v52, %v216_v51 }
 0x19e   :  { %v750_v53 = vpop.f32.mrf.mxu1 }
 0x1a0   :  { %v219_v54 = vpop.f32.mrf.mxu1 }
 0x1a1   :  { %v220_v56 = vadd.f32 %v654_v52, %v219_v54 }
 0x1a2   :  { %v751_v57 = vpop.f32.mrf.mxu1 }
 0x1a3   :  { %v577_v58 = vpack.c.bf16 %v220_v56, %v217_v55 }
 0x1a7   :  { %v788_v59 = vpop.f32.mrf.mxu0 }
 0x1a8   :  { %v521_v63 = vadd.f32 %v788_v59, %v672_v60 }
 0x1a9   :  { %v512_v61 = vpop.f32.mrf.mxu0 }
 0x1aa   :  { %v513_v3 = vadd.f32 %v672_v60, %v512_v61 }
 0x1ab   :  { %v789_v62 = vpop.f32.mrf.mxu0 }
 0x1ac   :  { %v524_v0 = vadd.f32 %v789_v62, %v672_v60 }
 0x1ad   :  { %v515_v2 = vpop.f32.mrf.mxu0 }
 0x1ae   :  { %v579_v4 = vpack.c.bf16 %v524_v0, %v521_v63  ;;  %v516_v5 = vadd.f32 %v672_v60, %v515_v2 }
 0x1af   :  { %v792_v6 = vpop.f32.mrf.mxu0 }
 0x1b0   :  { %v578_v7 = vpack.c.bf16 %v516_v5, %v513_v3  ;;  %v537_v32 = vadd.f32 %v792_v6, %v672_v60 }
 0x1b1   :  { %v528_v8 = vpop.f32.mrf.mxu0 }
 0x1b2   :  { %v529_v35 = vadd.f32 %v672_v60, %v528_v8 }
 0x1b3   :  { %v793_v9 = vpop.f32.mrf.mxu0 }
 0x1b4   :  { %v540_v31 = vadd.f32 %v793_v9, %v672_v60 }
 0x1b5   :  { %v531_v10 = vpop.f32.mrf.mxu0 }
 0x1b6   :  { %v581_v33 = vpack.c.bf16 %v540_v31, %v537_v32  ;;  %v532_v34 = vadd.f32 %v672_v60, %v531_v10 }
 0x1b7   :  { %v796_v11 = vpop.f32.mrf.mxu0 }
 0x1b8   :  { %v553_v26 = vadd.f32 %v796_v11, %v672_v60  ;;  %v580_v36 = vpack.c.bf16 %v532_v34, %v529_v35 }
 0x1b9   :  { %v544_v12 = vpop.f32.mrf.mxu0 }
 0x1ba   :  { %v545_v29 = vadd.f32 %v672_v60, %v544_v12 }
 0x1bb   :  { %v797_v13 = vpop.f32.mrf.mxu0 }
 0x1bc   :  { %v556_v25 = vadd.f32 %v797_v13, %v672_v60 }
 0x1bd   :  { %v547_v14 = vpop.f32.mrf.mxu0 }
 0x1be   :  { %v583_v27 = vpack.c.bf16 %v556_v25, %v553_v26  ;;  %v548_v28 = vadd.f32 %v672_v60, %v547_v14 }
 0x1bf   :  { %v800_v15 = vpop.f32.mrf.mxu0 }
 0x1c0   :  { %v569_v18 = vadd.f32 %v800_v15, %v672_v60  ;;  %v582_v30 = vpack.c.bf16 %v548_v28, %v545_v29 }
 0x1c1   :  { %v560_v16 = vpop.f32.mrf.mxu0 }
 0x1c2   :  { %v561_v23 = vadd.f32 %v672_v60, %v560_v16 }
 0x1c3   :  { %v801_v17 = vpop.f32.mrf.mxu0 }
 0x1c4   :  { %v572_v19 = vadd.f32 %v801_v17, %v672_v60 }
 0x1c5   :  { %v563_v21 = vpop.f32.mrf.mxu0 }
 0x1c6   :  { %v585_v20 = vpack.c.bf16 %v572_v19, %v569_v18  ;;  %v564_v22 = vadd.f32 %v672_v60, %v563_v21 }
 0x1c8   :  { %803 = vmatpush3.bf16.xpose.msra.mxu1 %v585_v20  ;;  %v584_v24 = vpack.c.bf16 %v564_v22, %v561_v23 }
 0x1c9   :  { %804 = vmatprep.subr.bf16.mxu1 %v903_v1 }
 0x1d0   :  { %805 = vmatpush3.bf16.xpose.msra.mxu1 %v584_v24 }
 0x1d1   :  { %806 = vmatprep.subr.bf16.mxu1 %v903_v1 }
 0x1d8   :  { %807 = vmatpush3.bf16.xpose.msra.mxu1 %v583_v27 }
 0x1d9   :  { %808 = vmatprep.subr.bf16.mxu1 %v903_v1 }
 0x1e0   :  { %809 = vmatpush3.bf16.xpose.msra.mxu1 %v582_v30 }
 0x1e1   :  { %810 = vmatprep.subr.bf16.mxu1 %v903_v1 }
 0x1e8   :  { %811 = vmatpush3.bf16.xpose.msra.mxu1 %v581_v33 }
 0x1e9   :  { %812 = vmatprep.subr.bf16.mxu1 %v903_v1 }
 0x1f0   :  { %813 = vmatpush3.bf16.xpose.msra.mxu1 %v580_v36 }
 0x1f1   :  { %814 = vmatprep.subr.bf16.mxu1 %v903_v1 }
 0x1f8   :  { %815 = vmatpush3.bf16.xpose.msra.mxu1 %v579_v4 }
 0x1f9   :  { %816 = vmatprep.subr.bf16.mxu1 %v903_v1 }
 0x200   :  { %817 = vmatpush3.bf16.xpose.msra.mxu1 %v578_v7 }
 0x207   :  { %819 = vmatmul.mubr.bf16.vlgmr.msra.gmra.mxu1 %v577_v58 }
 0x2c7   :  { %v620_v37 = vpop.f32.mrf.mxu1 }
 0x2c8   :  { %v627_v39 = vmul.f32 0.088388346, %v620_v37 }
 0x2c9   :  { %v820_v40 = vpop.f32.mrf.mxu1 }
 0x2ca   :  { %v631_v41 = vadd.f32 %v630_v38, %v627_v39 }
 0x2cb   :  { %v623_v42 = vpop.f32.mrf.mxu1 }
 0x2cc   :  { %633 = vst [vmem:[#allocation4] sm:$0xff] %v631_v41  ;;  %v628_v43 = vmul.f32 0.088388346, %v623_v42 }
 0x2cd   :  { %v821_v44 = vpop.f32.mrf.mxu1 }
 0x2ce   :  { %v632_v45 = vadd.f32 %v630_v38, %v628_v43 }
 0x2d0   :  { %634 = vst [vmem:[#allocation4 + $0x8] sm:$0xff] %v632_v45 }
 0x2d1   :  { %892 = shalt.err (!%p889_p4)
}
 0x2d2   :  { %s906_s0 = smov 128   ;;  %s907_s1 = smov 8  }
 0x2d3   :  { %646 = dma.vmem_to_hbm [thread:$0]  %s641_s25, 256, %s1136_s11, [#allocation5], %s906_s0, %s906_s0, %s907_s1  }
 0x2d4   :  { %901 = dma.done.wait [#allocation5], 256  }
 0x2d5   :  { %902 = vsyncadd [#allocation5], 4294967040 }
 0x2d6   :  { %650 = vsyncpa [#allocation5], 1 }

</bundles_post_ra>
